<compile_context>
chip_gen: v5e
topology: v5e:2x2
jax: 0.10.0
libtpu: 0.0.40
codegen_flags: <defaults>
</compile_context>

<pallas_src>
import math

import jax
import jax.numpy as jnp
from jax import lax
from jax.experimental import pallas as pl
from jax.experimental.pallas import tpu as pltpu


def _pick_head_group(n_heads, hd):
    # Smallest group size G (dividing n_heads) whose lane width G*hd is a
    # multiple of 128 (full vreg / MXU lanes); otherwise take all heads so the
    # projection / context blocks span the full hidden dim.
    for g in range(1, n_heads + 1):
        if n_heads % g == 0 and (g * hd) % 128 == 0:
            return g
    return n_heads


def _pick_tq(S):
    # Query-tile size: amortize the ~0.35us per-grid-step overhead while
    # keeping f32 softmax intermediates (~3*tq*S*4 bytes) bounded at long S
    # (v7x only has 64 MiB VMEM).
    if S % 256 == 0 and S <= 2048:
        return 256
    if S % 128 == 0:
        return 128
    return S


def _derive_vmem_limit(S, H, gw, tq, G, mask_mode, mask_itemsize,
                       return_probs, probs_itemsize, out_itemsize):
    # Double-buffered input blocks (bf16 x / weights, f32 biases).
    in_bytes = (S * H * 2
                + H * gw * 2 + gw * 4
                + H * 2 * gw * 2 + 2 * gw * 4)
    if mask_mode == "full":
        in_bytes += S * S * mask_itemsize
    elif mask_mode == "row":
        in_bytes += S * mask_itemsize
    out_bytes = tq * gw * out_itemsize
    if return_probs:
        out_bytes += G * tq * S * probs_itemsize
    scratch = 2 * S * gw * 2                      # K / V bf16 scratch
    compute = 4 * tq * S * 4 + (4 << 20)          # f32 scores/exp/probs + headroom
    derived = 2 * (in_bytes + out_bytes) + scratch + compute
    try:
        phys = pltpu.get_tpu_info().vmem_capacity_bytes
    except Exception:
        phys = 128 << 20                          # v5e/v6e default; v7x has 64 MiB
    cap = min(phys * 3 // 4, 96 << 20)
    return int(min(max(derived, 16 << 20), cap))


def _make_kernel(tq, hd, G, mask_mode, return_probs):
    gw = G * hd

    def kernel(*refs):
        it = iter(refs)
        x_ref = next(it)            # (S, H)        bf16
        wq_ref = next(it)           # (H, gw)       bf16, 1/sqrt(hd) folded in
        bq_ref = next(it)           # (1, gw)       f32,  scaled
        wkv_ref = next(it)          # (H, 2*gw)     bf16, [K group | V group]
        bkv_ref = next(it)          # (1, 2*gw)     f32
        mask_ref = next(it) if mask_mode != "none" else None
        ctx_ref = next(it)          # (tq, gw)
        probs_ref = next(it) if return_probs else None   # (G, tq, S)
        k_scr = next(it)            # (S, gw)       bf16
        v_scr = next(it)            # (S, gw)       bf16

        qt = pl.program_id(2)

        # --- fused K/V projection: once per (batch, head-group). -------------
        # Relies on the q-tile axis being the innermost, "arbitrary" grid axis
        # so the scratch persists across the t sweep for a fixed (b, g).
        @pl.when(qt == 0)
        def _():
            kv = jnp.dot(x_ref[...], wkv_ref[...],
                         preferred_element_type=jnp.float32)      # (S, 2*gw)
            kv = kv + bkv_ref[...]
            k_scr[...] = kv[:, :gw].astype(k_scr.dtype)
            v_scr[...] = kv[:, gw:].astype(v_scr.dtype)

        # --- Q projection for this q tile, all heads of the group at once. ---
        q0 = pl.multiple_of(qt * tq, tq)
        xq = x_ref[pl.ds(q0, tq), :]                               # (tq, H) bf16
        q = jnp.dot(xq, wq_ref[...], preferred_element_type=jnp.float32)
        q = (q + bq_ref[...]).astype(jnp.bfloat16)                 # (tq, gw)

        if mask_mode == "full":
            mrows = mask_ref[pl.ds(q0, tq), :].astype(jnp.float32)  # (tq, S)
        elif mask_mode == "row":
            mrows = mask_ref[...].astype(jnp.float32)               # (1, S)
        else:
            mrows = None

        # --- per-head attention core (hd-wide contraction is inherent). ------
        ctx_parts = []
        for h in range(G):                                # static unroll, G small
            lo, hi = h * hd, (h + 1) * hd
            qh = q[:, lo:hi]                              # (tq, hd) bf16
            kh = k_scr[:, lo:hi]                          # (S, hd)  bf16
            scores = lax.dot_general(
                qh, kh, dimension_numbers=(((1,), (1,)), ((), ())),
                preferred_element_type=jnp.float32)       # (tq, S)
            if mrows is not None:
                scores = scores + mrows
            m = jnp.max(scores, axis=-1, keepdims=True)
            e = jnp.exp(scores - m)
            denom = jnp.sum(e, axis=-1, keepdims=True)
            # Exact reciprocal when the probs are returned downstream;
            # approximate (EUP, ~free) otherwise.
            probs = e * pl.reciprocal(denom, approx=not return_probs)
            if return_probs:
                probs_ref[h] = probs.astype(probs_ref.dtype)   # lane-dense (tq, S)
            # dropout is identity in eval mode.
            ctx_parts.append(
                jnp.dot(probs.astype(jnp.bfloat16), v_scr[:, lo:hi],
                        preferred_element_type=jnp.float32))   # (tq, hd)

        ctx = ctx_parts[0] if G == 1 else jnp.concatenate(ctx_parts, axis=-1)
        ctx_ref[...] = ctx.astype(ctx_ref.dtype)          # (tq, gw), lane-dense

    return kernel


def bert_self_attention(hidden_states, params, mask=None, *, n_heads,
                        return_probs=False, probs_dtype=jnp.bfloat16):
    """BERT self-attention forward (eval mode: dropout = identity).

    hidden_states: (B, S, H).
    mask: None, additive (B, S, S), additive (B, 1, S) padding mask, or 4-D
          (B, 1, S, S) / (B, 1, 1, S) (the head axis is squeezed).
    params = (wq, bq, wk, bk, wv, bv); wX is (H, H) laid out (in_dim, out_dim)
    so each projection is x @ wX + bX; bX is (H,) or (1, H).

    Returns context (B, S, H); plus attention probs (B, n_heads, S, S) in
    `probs_dtype` when return_probs=True.
    """
    B, S, H = hidden_states.shape
    assert H % n_heads == 0
    hd = H // n_heads
    scale = 1.0 / math.sqrt(hd)

    G = _pick_head_group(n_heads, hd)      # heads per grid step
    NG = n_heads // G                      # number of head groups
    gw = G * hd                            # group lane width (>=128 or == H)
    tq = _pick_tq(S)
    q_tiles = S // tq

    wq, bq, wk, bk, wv, bv = params

    def group_w(w, s=1.0):
        w = (jnp.asarray(w, jnp.float32) * s).reshape(H, NG, gw)
        return w.transpose(1, 0, 2)                       # (NG, H, gw)

    def group_b(b, s=1.0):
        return (jnp.asarray(b, jnp.float32) * s).reshape(NG, 1, gw)

    wq_g = group_w(wq, scale).astype(jnp.bfloat16)        # scale folded into Q
    bq_g = group_b(bq, scale)
    wkv_g = jnp.concatenate([group_w(wk), group_w(wv)], axis=-1).astype(jnp.bfloat16)
    bkv_g = jnp.concatenate([group_b(bk), group_b(bv)], axis=-1)

    x_bf16 = hidden_states.astype(jnp.bfloat16)           # halve x HBM traffic

    # --- mask handling: never materialize a dense zero mask. -----------------
    if mask is not None and mask.ndim == 4 and mask.shape[1] == 1:
        mask = mask[:, 0]
    if mask is None:
        mask_mode = "none"
    elif mask.ndim == 3 and mask.shape[1] == 1:
        mask_mode = "row"
        assert mask.shape == (B, 1, S)
    else:
        mask_mode = "full"
        assert mask.shape == (B, S, S)

    out_dtype = hidden_states.dtype

    in_specs = [
        # hidden_states: one (S, H) block per batch, resident across g and t.
        pl.BlockSpec((None, S, H), lambda b, g, t: (b, 0, 0)),
        pl.BlockSpec((None, H, gw), lambda b, g, t: (g, 0, 0)),       # wq (scaled)
        pl.BlockSpec((None, 1, gw), lambda b, g, t: (g, 0, 0)),       # bq (scaled)
        pl.BlockSpec((None, H, 2 * gw), lambda b, g, t: (g, 0, 0)),   # [wk | wv]
        pl.BlockSpec((None, 1, 2 * gw), lambda b, g, t: (g, 0, 0)),   # [bk | bv]
    ]
    inputs = [x_bf16, wq_g, bq_g, wkv_g, bkv_g]
    if mask_mode == "full":
        # Full (S, S) block per batch, resident across g and t (no re-DMA/head).
        in_specs.append(pl.BlockSpec((None, S, S), lambda b, g, t: (b, 0, 0)))
        inputs.append(mask)
    elif mask_mode == "row":
        in_specs.append(pl.BlockSpec((None, 1, S), lambda b, g, t: (b, 0, 0)))
        inputs.append(mask)

    # Context goes straight into (B, S, H): block last dim gw is 128-aligned at
    # real BERT shapes (or the full H), so stores are unmasked and lane-dense,
    # and no post-kernel transpose/reshape is needed.
    out_shapes = [jax.ShapeDtypeStruct((B, S, H), out_dtype)]
    out_specs = [pl.BlockSpec((None, tq, gw), lambda b, g, t: (b, t, g))]
    if return_probs:
        out_shapes.append(jax.ShapeDtypeStruct((B, n_heads, S, S), probs_dtype))
        out_specs.append(
            pl.BlockSpec((None, G, tq, S), lambda b, g, t: (b, g, t, 0)))

    mask_itemsize = jnp.dtype(mask.dtype).itemsize if mask_mode != "none" else 0
    vmem_limit = _derive_vmem_limit(
        S, H, gw, tq, G, mask_mode, mask_itemsize, return_probs,
        jnp.dtype(probs_dtype).itemsize, jnp.dtype(out_dtype).itemsize)

    grid_spec = pltpu.PrefetchScalarGridSpec(
        num_scalar_prefetch=0,
        grid=(B, NG, q_tiles),
        in_specs=in_specs,
        out_specs=out_specs,
        scratch_shapes=[pltpu.VMEM((S, gw), jnp.bfloat16),   # K for current (b, g)
                        pltpu.VMEM((S, gw), jnp.bfloat16)],  # V for current (b, g)
    )

    # The q-tile axis must stay innermost and "arbitrary": K/V scratch is filled
    # at qt == 0 and reused across the t sweep.  (b, g) are megacore-parallel.
    dim_sem = ("parallel", "parallel", "arbitrary")

    outs = pl.pallas_call(
        _make_kernel(tq, hd, G, mask_mode, return_probs),
        out_shape=tuple(out_shapes),
        grid_spec=grid_spec,
        compiler_params=pltpu.CompilerParams(
            dimension_semantics=dim_sem,
            vmem_limit_bytes=vmem_limit),
    )(*inputs)

    if return_probs:
        context, probs = outs
        return context, probs
    (context,) = outs
    return context


def _reference(hidden_states, params, mask, n_heads):
    """Pure-JAX f32 reference mirroring the PyTorch forward (eval mode)."""
    B, S, H = hidden_states.shape
    hd = H // n_heads
    wq, bq, wk, bk, wv, bv = params
    x = hidden_states.astype(jnp.float32)

    def proj(w, b):
        y = x @ jnp.asarray(w, jnp.float32) + jnp.asarray(b, jnp.float32).reshape(-1)
        return y.reshape(B, S, n_heads, hd).transpose(0, 2, 1, 3)   # (B, nh, S, hd)

    q, k, v = proj(wq, bq), proj(wk, bk), proj(wv, bv)
    scores = jnp.einsum('bhqd,bhkd->bhqk', q, k) / math.sqrt(hd)
    if mask is not None:
        scores = scores + mask[:, None, :, :].astype(jnp.float32)
    probs = jax.nn.softmax(scores, axis=-1)
    ctx = jnp.einsum('bhqk,bhkd->bhqd', probs, v)
    ctx = ctx.transpose(0, 2, 1, 3).reshape(B, S, H)
    return ctx, probs


if __name__ == "__main__":
    # Small shapes consistent with the module: batch=2, seq=8, hidden=32, heads=4.
    B, S, H, NH = 2, 8, 32, 4
    key = jax.random.PRNGKey(0)
    k_x, k_m, kq, kbq, kk, kbk, kv_, kbv = jax.random.split(key, 8)

    hidden_states = jax.random.normal(k_x, (B, S, H), dtype=jnp.float32)
    full_mask = 0.1 * jax.random.normal(k_m, (B, S, S), dtype=jnp.float32)
    row_mask = jnp.broadcast_to(
        jnp.where(jnp.arange(S) < S - 2, 0.0, -1e4).astype(jnp.float32),
        (B, 1, S))

    init = lambda k, shape: 0.02 * jax.random.normal(k, shape, dtype=jnp.float32)
    params = (
        init(kq, (H, H)), init(kbq, (1, H)),
        init(kk, (H, H)), init(kbk, (1, H)),
        init(kv_, (H, H)), init(kbv, (1, H)),
    )

    tol = dict(atol=2e-2, rtol=2e-2)   # bf16 MXU operands

    # 1) dense (B, S, S) additive mask, probs requested (stored in bf16).
    ctx1, probs1 = bert_self_attention(hidden_states, params, full_mask,
                                       n_heads=NH, return_probs=True)
    ctx1 = jax.block_until_ready(ctx1)
    probs1 = jax.block_until_ready(probs1)
    ref_ctx1, ref_probs1 = _reference(hidden_states, params, full_mask, NH)
    assert jnp.allclose(ctx1, ref_ctx1, **tol), "context mismatch (full mask)"
    assert jnp.allclose(probs1.astype(jnp.float32), ref_probs1, **tol), \
        "probs mismatch"

    # 2) BERT-style (B, 1, S) padding mask, context only (default fast path).
    ctx2 = jax.block_until_ready(
        bert_self_attention(hidden_states, params, row_mask, n_heads=NH))
    ref_ctx2, _ = _reference(hidden_states, params, row_mask, NH)
    assert jnp.allclose(ctx2, ref_ctx2, **tol), "context mismatch (row mask)"

    # 3) no mask.
    ctx3 = jax.block_until_ready(
        bert_self_attention(hidden_states, params, None, n_heads=NH))
    ref_ctx3, _ = _reference(hidden_states, params, None, NH)
    assert jnp.allclose(ctx3, ref_ctx3, **tol), "context mismatch (no mask)"

    print("KERNEL_OK")
</pallas_src>

<mosaic_0001>
module attributes {stable_mosaic.version = 11 : i64} {
  func.func @kernel(%arg0: i32, %arg1: i32, %arg2: i32, %arg3: memref<1x8x32xbf16, #tpu.memory_space<vmem>>, %arg4: memref<1x32x32xbf16, #tpu.memory_space<vmem>>, %arg5: memref<1x1x32xf32, #tpu.memory_space<vmem>>, %arg6: memref<1x32x64xbf16, #tpu.memory_space<vmem>>, %arg7: memref<1x1x64xf32, #tpu.memory_space<vmem>>, %arg8: memref<1x8x8xf32, #tpu.memory_space<vmem>>, %arg9: memref<1x8x32xf32, #tpu.memory_space<vmem>>, %arg10: memref<1x4x8x8xbf16, #tpu.memory_space<vmem>>, %arg11: memref<8x32xbf16, #tpu.memory_space<vmem>>, %arg12: memref<8x32xbf16, #tpu.memory_space<vmem>>) attributes {dimension_semantics = [#tpu.dimension_semantics<parallel>, #tpu.dimension_semantics<parallel>, #tpu.dimension_semantics<arbitrary>], iteration_bounds = array<i64: 2, 1, 1>, scalar_prefetch = 0 : i64, scratch_operands = 2 : i64, tpu.core_type = #tpu.core_type<tc>, window_params = [{transform_indices = @transform_0, window_bounds = array<i64: 1, 8, 32>}, {transform_indices = @transform_1, window_bounds = array<i64: 1, 32, 32>}, {transform_indices = @transform_2, window_bounds = array<i64: 1, 1, 32>}, {transform_indices = @transform_3, window_bounds = array<i64: 1, 32, 64>}, {transform_indices = @transform_4, window_bounds = array<i64: 1, 1, 64>}, {transform_indices = @transform_5, window_bounds = array<i64: 1, 8, 8>}, {transform_indices = @transform_6, window_bounds = array<i64: 1, 8, 32>}, {transform_indices = @transform_7, window_bounds = array<i64: 1, 4, 8, 8>}]} {
    %c0_i32 = arith.constant 0 : i32
    %0 = arith.cmpi eq, %arg2, %c0_i32 : i32
    %1 = arith.extui %0 : i1 to i32
    %c0_i32_0 = arith.constant 0 : i32
    %2 = arith.cmpi ne, %1, %c0_i32_0 : i32
    scf.if %2 {
      %c0_55 = arith.constant 0 : index
      %c0_56 = arith.constant 0 : index
      %c0_57 = arith.constant 0 : index
      %107 = vector.load %arg3[%c0_55, %c0_56, %c0_57] : memref<1x8x32xbf16, #tpu.memory_space<vmem>>, vector<1x8x32xbf16>
      %108 = vector.shape_cast %107 : vector<1x8x32xbf16> to vector<8x32xbf16>
      %c0_58 = arith.constant 0 : index
      %c0_59 = arith.constant 0 : index
      %c0_60 = arith.constant 0 : index
      %109 = vector.load %arg6[%c0_58, %c0_59, %c0_60] : memref<1x32x64xbf16, #tpu.memory_space<vmem>>, vector<1x32x64xbf16>
      %110 = vector.shape_cast %109 : vector<1x32x64xbf16> to vector<32x64xbf16>
      %cst_61 = arith.constant dense<0.000000e+00> : vector<8x64xf32>
      %111 = tpu.matmul %108, %110, %cst_61 {dimension_numbers = #tpu.dot_dimension_numbers<[1], [0], [0], [1], [0, 0, 1, 1], [], []>} : vector<8x32xbf16>, vector<32x64xbf16>, vector<8x64xf32> -> vector<8x64xf32>
      %c0_62 = arith.constant 0 : index
      %c0_63 = arith.constant 0 : index
      %c0_64 = arith.constant 0 : index
      %112 = vector.load %arg7[%c0_62, %c0_63, %c0_64] : memref<1x1x64xf32, #tpu.memory_space<vmem>>, vector<1x1x64xf32>
      %113 = vector.shape_cast %112 : vector<1x1x64xf32> to vector<1x64xf32>
      %114 = vector.broadcast %113 : vector<1x64xf32> to vector<8x64xf32>
      %115 = arith.addf %111, %114 : vector<8x64xf32>
      %116 = vector.extract_strided_slice %115 {offsets = [0, 0], sizes = [8, 32], strides = [1, 1]} : vector<8x64xf32> to vector<8x32xf32>
      %117 = arith.truncf %116 : vector<8x32xf32> to vector<8x32xbf16>
      %c0_65 = arith.constant 0 : index
      %c0_66 = arith.constant 0 : index
      %118 = vector.load %arg11[%c0_65, %c0_66] : memref<8x32xbf16, #tpu.memory_space<vmem>>, vector<8x32xbf16>
      tpu.vector_store %arg11[%c0_65, %c0_66], %117 {strides = array<i32>} : memref<8x32xbf16, #tpu.memory_space<vmem>>, vector<8x32xbf16>,
      %119 = vector.extract_strided_slice %115 {offsets = [0, 32], sizes = [8, 32], strides = [1, 1]} : vector<8x64xf32> to vector<8x32xf32>
      %120 = arith.truncf %119 : vector<8x32xf32> to vector<8x32xbf16>
      %c0_67 = arith.constant 0 : index
      %c0_68 = arith.constant 0 : index
      %121 = vector.load %arg12[%c0_67, %c0_68] : memref<8x32xbf16, #tpu.memory_space<vmem>>, vector<8x32xbf16>
      tpu.vector_store %arg12[%c0_67, %c0_68], %120 {strides = array<i32>} : memref<8x32xbf16, #tpu.memory_space<vmem>>, vector<8x32xbf16>,
    } else {
    }
    %c8_i32 = arith.constant 8 : i32
    %3 = arith.muli %arg2, %c8_i32 : i32
    %4 = tpu.assume_multiple %3, 8 : i32
    %c0 = arith.constant 0 : index
    %5 = arith.index_cast %4 : i32 to index
    %c0_1 = arith.constant 0 : index
    %6 = vector.load %arg3[%c0, %5, %c0_1] : memref<1x8x32xbf16, #tpu.memory_space<vmem>>, vector<1x8x32xbf16>
    %7 = vector.shape_cast %6 : vector<1x8x32xbf16> to vector<8x32xbf16>
    %c0_2 = arith.constant 0 : index
    %c0_3 = arith.constant 0 : index
    %c0_4 = arith.constant 0 : index
    %8 = vector.load %arg4[%c0_2, %c0_3, %c0_4] : memref<1x32x32xbf16, #tpu.memory_space<vmem>>, vector<1x32x32xbf16>
    %9 = vector.shape_cast %8 : vector<1x32x32xbf16> to vector<32x32xbf16>
    %cst = arith.constant dense<0.000000e+00> : vector<8x32xf32>
    %10 = tpu.matmul %7, %9, %cst {dimension_numbers = #tpu.dot_dimension_numbers<[1], [0], [0], [1], [0, 0, 1, 1], [], []>} : vector<8x32xbf16>, vector<32x32xbf16>, vector<8x32xf32> -> vector<8x32xf32>
    %c0_5 = arith.constant 0 : index
    %c0_6 = arith.constant 0 : index
    %c0_7 = arith.constant 0 : index
    %11 = vector.load %arg5[%c0_5, %c0_6, %c0_7] : memref<1x1x32xf32, #tpu.memory_space<vmem>>, vector<1x1x32xf32>
    %12 = vector.shape_cast %11 : vector<1x1x32xf32> to vector<1x32xf32>
    %13 = vector.broadcast %12 : vector<1x32xf32> to vector<8x32xf32>
    %14 = arith.addf %10, %13 : vector<8x32xf32>
    %15 = arith.truncf %14 : vector<8x32xf32> to vector<8x32xbf16>
    %c0_8 = arith.constant 0 : index
    %16 = arith.index_cast %4 : i32 to index
    %c0_9 = arith.constant 0 : index
    %17 = vector.load %arg8[%c0_8, %16, %c0_9] : memref<1x8x8xf32, #tpu.memory_space<vmem>>, vector<1x8x8xf32>
    %18 = vector.shape_cast %17 : vector<1x8x8xf32> to vector<8x8xf32>
    %19 = vector.extract_strided_slice %15 {offsets = [0, 0], sizes = [8, 8], strides = [1, 1]} : vector<8x32xbf16> to vector<8x8xbf16>
    %c0_10 = arith.constant 0 : index
    %c0_11 = arith.constant 0 : index
    %20 = vector.load %arg11[%c0_10, %c0_11] : memref<8x32xbf16, #tpu.memory_space<vmem>>, vector<8x8xbf16>
    %cst_12 = arith.constant dense<0.000000e+00> : vector<8x8xf32>
    %21 = tpu.matmul %19, %20, %cst_12 {dimension_numbers = #tpu.dot_dimension_numbers<[1], [1], [0], [0], [0, 0, 1, 0], [], []>} : vector<8x8xbf16>, vector<8x8xbf16>, vector<8x8xf32> -> vector<8x8xf32>
    %22 = arith.addf %21, %18 : vector<8x8xf32>
    %cst_13 = arith.constant dense<0xFF800000> : vector<8xf32>
    %23 = vector.multi_reduction <maximumf>, %22, %cst_13 [1] : vector<8x8xf32> to vector<8xf32>
    %24 = vector.shape_cast %23 : vector<8xf32> to vector<8x1xf32>
    %25 = vector.broadcast %24 : vector<8x1xf32> to vector<8x8xf32>
    %26 = arith.subf %22, %25 : vector<8x8xf32>
    %27 = math.exp %26 : vector<8x8xf32>
    %cst_14 = arith.constant dense<0.000000e+00> : vector<8xf32>
    %28 = vector.multi_reduction <add>, %27, %cst_14 [1] : vector<8x8xf32> to vector<8xf32>
    %29 = vector.shape_cast %28 : vector<8xf32> to vector<8x1xf32>
    %30 = tpu.reciprocal %29 : vector<8x1xf32> -> vector<8x1xf32>
    %31 = vector.broadcast %30 : vector<8x1xf32> to vector<8x8xf32>
    %32 = arith.mulf %27, %31 : vector<8x8xf32>
    %33 = arith.truncf %32 : vector<8x8xf32> to vector<8x8xbf16>
    %c0_15 = arith.constant 0 : index
    %c0_16 = arith.constant 0 : index
    %c0_17 = arith.constant 0 : index
    %c0_18 = arith.constant 0 : index
    %34 = vector.load %arg10[%c0_15, %c0_16, %c0_17, %c0_18] : memref<1x4x8x8xbf16, #tpu.memory_space<vmem>>, vector<1x1x8x8xbf16>
    %35 = vector.shape_cast %34 : vector<1x1x8x8xbf16> to vector<8x8xbf16>
    %36 = vector.shape_cast %33 : vector<8x8xbf16> to vector<1x1x8x8xbf16>
    tpu.vector_store %arg10[%c0_15, %c0_16, %c0_17, %c0_18], %36 {strides = array<i32>} : memref<1x4x8x8xbf16, #tpu.memory_space<vmem>>, vector<1x1x8x8xbf16>,
    %37 = arith.truncf %32 : vector<8x8xf32> to vector<8x8xbf16>
    %c0_19 = arith.constant 0 : index
    %c0_20 = arith.constant 0 : index
    %38 = vector.load %arg12[%c0_19, %c0_20] : memref<8x32xbf16, #tpu.memory_space<vmem>>, vector<8x8xbf16>
    %cst_21 = arith.constant dense<0.000000e+00> : vector<8x8xf32>
    %39 = tpu.matmul %37, %38, %cst_21 {dimension_numbers = #tpu.dot_dimension_numbers<[1], [0], [0], [1], [0, 0, 1, 1], [], []>} : vector<8x8xbf16>, vector<8x8xbf16>, vector<8x8xf32> -> vector<8x8xf32>
    %40 = vector.extract_strided_slice %15 {offsets = [0, 8], sizes = [8, 8], strides = [1, 1]} : vector<8x32xbf16> to vector<8x8xbf16>
    %c0_22 = arith.constant 0 : index
    %c8 = arith.constant 8 : index
    %41 = vector.load %arg11[%c0_22, %c8] : memref<8x32xbf16, #tpu.memory_space<vmem>>, vector<8x8xbf16>
    %cst_23 = arith.constant dense<0.000000e+00> : vector<8x8xf32>
    %42 = tpu.matmul %40, %41, %cst_23 {dimension_numbers = #tpu.dot_dimension_numbers<[1], [1], [0], [0], [0, 0, 1, 0], [], []>} : vector<8x8xbf16>, vector<8x8xbf16>, vector<8x8xf32> -> vector<8x8xf32>
    %43 = arith.addf %42, %18 : vector<8x8xf32>
    %cst_24 = arith.constant dense<0xFF800000> : vector<8xf32>
    %44 = vector.multi_reduction <maximumf>, %43, %cst_24 [1] : vector<8x8xf32> to vector<8xf32>
    %45 = vector.shape_cast %44 : vector<8xf32> to vector<8x1xf32>
    %46 = vector.broadcast %45 : vector<8x1xf32> to vector<8x8xf32>
    %47 = arith.subf %43, %46 : vector<8x8xf32>
    %48 = math.exp %47 : vector<8x8xf32>
    %cst_25 = arith.constant dense<0.000000e+00> : vector<8xf32>
    %49 = vector.multi_reduction <add>, %48, %cst_25 [1] : vector<8x8xf32> to vector<8xf32>
    %50 = vector.shape_cast %49 : vector<8xf32> to vector<8x1xf32>
    %51 = tpu.reciprocal %50 : vector<8x1xf32> -> vector<8x1xf32>
    %52 = vector.broadcast %51 : vector<8x1xf32> to vector<8x8xf32>
    %53 = arith.mulf %48, %52 : vector<8x8xf32>
    %54 = arith.truncf %53 : vector<8x8xf32> to vector<8x8xbf16>
    %c0_26 = arith.constant 0 : index
    %c1 = arith.constant 1 : index
    %c0_27 = arith.constant 0 : index
    %c0_28 = arith.constant 0 : index
    %55 = vector.load %arg10[%c0_26, %c1, %c0_27, %c0_28] : memref<1x4x8x8xbf16, #tpu.memory_space<vmem>>, vector<1x1x8x8xbf16>
    %56 = vector.shape_cast %55 : vector<1x1x8x8xbf16> to vector<8x8xbf16>
    %57 = vector.shape_cast %54 : vector<8x8xbf16> to vector<1x1x8x8xbf16>
    tpu.vector_store %arg10[%c0_26, %c1, %c0_27, %c0_28], %57 {strides = array<i32>} : memref<1x4x8x8xbf16, #tpu.memory_space<vmem>>, vector<1x1x8x8xbf16>,
    %58 = arith.truncf %53 : vector<8x8xf32> to vector<8x8xbf16>
    %c0_29 = arith.constant 0 : index
    %c8_30 = arith.constant 8 : index
    %59 = vector.load %arg12[%c0_29, %c8_30] : memref<8x32xbf16, #tpu.memory_space<vmem>>, vector<8x8xbf16>
    %cst_31 = arith.constant dense<0.000000e+00> : vector<8x8xf32>
    %60 = tpu.matmul %58, %59, %cst_31 {dimension_numbers = #tpu.dot_dimension_numbers<[1], [0], [0], [1], [0, 0, 1, 1], [], []>} : vector<8x8xbf16>, vector<8x8xbf16>, vector<8x8xf32> -> vector<8x8xf32>
    %61 = vector.extract_strided_slice %15 {offsets = [0, 16], sizes = [8, 8], strides = [1, 1]} : vector<8x32xbf16> to vector<8x8xbf16>
    %c0_32 = arith.constant 0 : index
    %c16 = arith.constant 16 : index
    %62 = vector.load %arg11[%c0_32, %c16] : memref<8x32xbf16, #tpu.memory_space<vmem>>, vector<8x8xbf16>
    %cst_33 = arith.constant dense<0.000000e+00> : vector<8x8xf32>
    %63 = tpu.matmul %61, %62, %cst_33 {dimension_numbers = #tpu.dot_dimension_numbers<[1], [1], [0], [0], [0, 0, 1, 0], [], []>} : vector<8x8xbf16>, vector<8x8xbf16>, vector<8x8xf32> -> vector<8x8xf32>
    %64 = arith.addf %63, %18 : vector<8x8xf32>
    %cst_34 = arith.constant dense<0xFF800000> : vector<8xf32>
    %65 = vector.multi_reduction <maximumf>, %64, %cst_34 [1] : vector<8x8xf32> to vector<8xf32>
    %66 = vector.shape_cast %65 : vector<8xf32> to vector<8x1xf32>
    %67 = vector.broadcast %66 : vector<8x1xf32> to vector<8x8xf32>
    %68 = arith.subf %64, %67 : vector<8x8xf32>
    %69 = math.exp %68 : vector<8x8xf32>
    %cst_35 = arith.constant dense<0.000000e+00> : vector<8xf32>
    %70 = vector.multi_reduction <add>, %69, %cst_35 [1] : vector<8x8xf32> to vector<8xf32>
    %71 = vector.shape_cast %70 : vector<8xf32> to vector<8x1xf32>
    %72 = tpu.reciprocal %71 : vector<8x1xf32> -> vector<8x1xf32>
    %73 = vector.broadcast %72 : vector<8x1xf32> to vector<8x8xf32>
    %74 = arith.mulf %69, %73 : vector<8x8xf32>
    %75 = arith.truncf %74 : vector<8x8xf32> to vector<8x8xbf16>
    %c0_36 = arith.constant 0 : index
    %c2 = arith.constant 2 : index
    %c0_37 = arith.constant 0 : index
    %c0_38 = arith.constant 0 : index
    %76 = vector.load %arg10[%c0_36, %c2, %c0_37, %c0_38] : memref<1x4x8x8xbf16, #tpu.memory_space<vmem>>, vector<1x1x8x8xbf16>
    %77 = vector.shape_cast %76 : vector<1x1x8x8xbf16> to vector<8x8xbf16>
    %78 = vector.shape_cast %75 : vector<8x8xbf16> to vector<1x1x8x8xbf16>
    tpu.vector_store %arg10[%c0_36, %c2, %c0_37, %c0_38], %78 {strides = array<i32>} : memref<1x4x8x8xbf16, #tpu.memory_space<vmem>>, vector<1x1x8x8xbf16>,
    %79 = arith.truncf %74 : vector<8x8xf32> to vector<8x8xbf16>
    %c0_39 = arith.constant 0 : index
    %c16_40 = arith.constant 16 : index
    %80 = vector.load %arg12[%c0_39, %c16_40] : memref<8x32xbf16, #tpu.memory_space<vmem>>, vector<8x8xbf16>
    %cst_41 = arith.constant dense<0.000000e+00> : vector<8x8xf32>
    %81 = tpu.matmul %79, %80, %cst_41 {dimension_numbers = #tpu.dot_dimension_numbers<[1], [0], [0], [1], [0, 0, 1, 1], [], []>} : vector<8x8xbf16>, vector<8x8xbf16>, vector<8x8xf32> -> vector<8x8xf32>
    %82 = vector.extract_strided_slice %15 {offsets = [0, 24], sizes = [8, 8], strides = [1, 1]} : vector<8x32xbf16> to vector<8x8xbf16>
    %c0_42 = arith.constant 0 : index
    %c24 = arith.constant 24 : index
    %83 = vector.load %arg11[%c0_42, %c24] : memref<8x32xbf16, #tpu.memory_space<vmem>>, vector<8x8xbf16>
    %cst_43 = arith.constant dense<0.000000e+00> : vector<8x8xf32>
    %84 = tpu.matmul %82, %83, %cst_43 {dimension_numbers = #tpu.dot_dimension_numbers<[1], [1], [0], [0], [0, 0, 1, 0], [], []>} : vector<8x8xbf16>, vector<8x8xbf16>, vector<8x8xf32> -> vector<8x8xf32>
    %85 = arith.addf %84, %18 : vector<8x8xf32>
    %cst_44 = arith.constant dense<0xFF800000> : vector<8xf32>
    %86 = vector.multi_reduction <maximumf>, %85, %cst_44 [1] : vector<8x8xf32> to vector<8xf32>
    %87 = vector.shape_cast %86 : vector<8xf32> to vector<8x1xf32>
    %88 = vector.broadcast %87 : vector<8x1xf32> to vector<8x8xf32>
    %89 = arith.subf %85, %88 : vector<8x8xf32>
    %90 = math.exp %89 : vector<8x8xf32>
    %cst_45 = arith.constant dense<0.000000e+00> : vector<8xf32>
    %91 = vector.multi_reduction <add>, %90, %cst_45 [1] : vector<8x8xf32> to vector<8xf32>
    %92 = vector.shape_cast %91 : vector<8xf32> to vector<8x1xf32>
    %93 = tpu.reciprocal %92 : vector<8x1xf32> -> vector<8x1xf32>
    %94 = vector.broadcast %93 : vector<8x1xf32> to vector<8x8xf32>
    %95 = arith.mulf %90, %94 : vector<8x8xf32>
    %96 = arith.truncf %95 : vector<8x8xf32> to vector<8x8xbf16>
    %c0_46 = arith.constant 0 : index
    %c3 = arith.constant 3 : index
    %c0_47 = arith.constant 0 : index
    %c0_48 = arith.constant 0 : index
    %97 = vector.load %arg10[%c0_46, %c3, %c0_47, %c0_48] : memref<1x4x8x8xbf16, #tpu.memory_space<vmem>>, vector<1x1x8x8xbf16>
    %98 = vector.shape_cast %97 : vector<1x1x8x8xbf16> to vector<8x8xbf16>
    %99 = vector.shape_cast %96 : vector<8x8xbf16> to vector<1x1x8x8xbf16>
    tpu.vector_store %arg10[%c0_46, %c3, %c0_47, %c0_48], %99 {strides = array<i32>} : memref<1x4x8x8xbf16, #tpu.memory_space<vmem>>, vector<1x1x8x8xbf16>,
    %100 = arith.truncf %95 : vector<8x8xf32> to vector<8x8xbf16>
    %c0_49 = arith.constant 0 : index
    %c24_50 = arith.constant 24 : index
    %101 = vector.load %arg12[%c0_49, %c24_50] : memref<8x32xbf16, #tpu.memory_space<vmem>>, vector<8x8xbf16>
    %cst_51 = arith.constant dense<0.000000e+00> : vector<8x8xf32>
    %102 = tpu.matmul %100, %101, %cst_51 {dimension_numbers = #tpu.dot_dimension_numbers<[1], [0], [0], [1], [0, 0, 1, 1], [], []>} : vector<8x8xbf16>, vector<8x8xbf16>, vector<8x8xf32> -> vector<8x8xf32>
    %103 = tpu.concatenate %39, %60, %81, %102 in 1 : vector<8x8xf32>, vector<8x8xf32>, vector<8x8xf32>, vector<8x8xf32> -> vector<8x32xf32>
    %c0_52 = arith.constant 0 : index
    %c0_53 = arith.constant 0 : index
    %c0_54 = arith.constant 0 : index
    %104 = vector.load %arg9[%c0_52, %c0_53, %c0_54] : memref<1x8x32xf32, #tpu.memory_space<vmem>>, vector<1x8x32xf32>
    %105 = vector.shape_cast %104 : vector<1x8x32xf32> to vector<8x32xf32>
    %106 = vector.shape_cast %103 : vector<8x32xf32> to vector<1x8x32xf32>
    tpu.vector_store %arg9[%c0_52, %c0_53, %c0_54], %106 {strides = array<i32>} : memref<1x8x32xf32, #tpu.memory_space<vmem>>, vector<1x8x32xf32>,
    return
  }
  func.func @transform_0(%arg0: i32, %arg1: i32, %arg2: i32) -> (i32, i32, i32) {
    %c0_i32 = arith.constant 0 : i32
    %c0_i32_0 = arith.constant 0 : i32
    %c0_i32_1 = arith.constant 0 : i32
    return %arg0, %c0_i32, %c0_i32_0 : i32, i32, i32
  }
  func.func @transform_1(%arg0: i32, %arg1: i32, %arg2: i32) -> (i32, i32, i32) {
    %c0_i32 = arith.constant 0 : i32
    %c0_i32_0 = arith.constant 0 : i32
    %c0_i32_1 = arith.constant 0 : i32
    return %arg1, %c0_i32, %c0_i32_0 : i32, i32, i32
  }
  func.func @transform_2(%arg0: i32, %arg1: i32, %arg2: i32) -> (i32, i32, i32) {
    %c0_i32 = arith.constant 0 : i32
    %c0_i32_0 = arith.constant 0 : i32
    %c0_i32_1 = arith.constant 0 : i32
    return %arg1, %c0_i32, %c0_i32_0 : i32, i32, i32
  }
  func.func @transform_3(%arg0: i32, %arg1: i32, %arg2: i32) -> (i32, i32, i32) {
    %c0_i32 = arith.constant 0 : i32
    %c0_i32_0 = arith.constant 0 : i32
    %c0_i32_1 = arith.constant 0 : i32
    return %arg1, %c0_i32, %c0_i32_0 : i32, i32, i32
  }
  func.func @transform_4(%arg0: i32, %arg1: i32, %arg2: i32) -> (i32, i32, i32) {
    %c0_i32 = arith.constant 0 : i32
    %c0_i32_0 = arith.constant 0 : i32
    %c0_i32_1 = arith.constant 0 : i32
    return %arg1, %c0_i32, %c0_i32_0 : i32, i32, i32
  }
  func.func @transform_5(%arg0: i32, %arg1: i32, %arg2: i32) -> (i32, i32, i32) {
    %c0_i32 = arith.constant 0 : i32
    %c0_i32_0 = arith.constant 0 : i32
    %c0_i32_1 = arith.constant 0 : i32
    return %arg0, %c0_i32, %c0_i32_0 : i32, i32, i32
  }
  func.func @transform_6(%arg0: i32, %arg1: i32, %arg2: i32) -> (i32, i32, i32) {
    %c0_i32 = arith.constant 0 : i32
    return %arg0, %arg2, %arg1 : i32, i32, i32
  }
  func.func @transform_7(%arg0: i32, %arg1: i32, %arg2: i32) -> (i32, i32, i32, i32) {
    %c0_i32 = arith.constant 0 : i32
    %c0_i32_0 = arith.constant 0 : i32
    return %arg0, %arg1, %arg2, %c0_i32 : i32, i32, i32, i32
  }
}

</mosaic_0001>

<bundles_post_ra>
// kernel: tpu_custom_call.1
= control target key start
LH: loop header
LB: loop body
LE: loop exit
PB: predicated region body
PF: predicated region fallthrough
CT: control target
= control target key end

     0   :  { %s1842_s0 = inlined_call_operand.hbm [shape: bf16[2,8,32], index: 0, kind: input, shape index: {}]   ;;  %s1843_s1 = inlined_call_operand.hbm [shape: bf16[1,32,32], index: 1, kind: input, shape index: {}]   ;;  %s1844_s2 = inlined_call_operand.vmem [shape: f32[1,1,32], index: 2, kind: input, shape index: {}]   ;;  %s1845_s3 = inlined_call_operand.hbm [shape: bf16[1,32,64], index: 3, kind: input, shape index: {}]   ;;  %s1846_s4 = inlined_call_operand.vmem [shape: f32[1,1,64], index: 4, kind: input, shape index: {}]   ;;  %s1847_s5 = inlined_call_operand.hbm [shape: f32[2,8,8], index: 5, kind: input, shape index: {}]   ;;  %s1848_s6 = inlined_call_operand.hbm [shape: f32[2,8,32], index: 6, kind: output, shape index: {0}]   ;;  %s1849_s7 = inlined_call_operand.hbm [shape: bf16[2,4,8,8], index: 7, kind: output, shape index: {1}]  }
   0x1   :  { %1857 = sst [smem:[#allocation26_spill]] %s1843_s1 }
   0x2   :  { %1858 = sst [smem:[#allocation27_spill]] %s1845_s3 }
   0x3   :  { %1859 = sst [smem:[#allocation28_spill]] %s1848_s6 }
   0x4   :  { %13 = vsyncpa [#allocation5], 0 }
   0x5   :  { %15 = vsyncpa [#allocation5 + $0x1], 0 }
   0x6   :  { %16 = vsyncpa [#allocation8], 0 }
   0x7   :  { %17 = vsyncpa [#allocation11], 0 }
   0x8   :  { %19 = vsyncpa [#allocation11 + $0x1], 0 }
   0x9   :  { %20 = vsyncpa [#allocation6], 0 }
   0xa   :  { %22 = vsyncpa [#allocation6 + $0x1], 0 }
   0xb   :  { %23 = vsyncpa [#allocation14], 0 }
   0xc   :  { %25 = vsyncpa [#allocation14 + $0x1], 0  ;;  %s1591_s24 = smov 0   ;;  %s1593_s25 = smov 0  }
   0xd   :  { %s1595_s26 = smov 0   ;;  %s1597_s27 = smov 0  }
   0xe   :  { %s1599_s28 = smov 0   ;;  %s1601_s29 = smov 0  }
   0xf LB: > { %1860 = sst [smem:[#allocation20_spill]] %s1516_s24  ;;  %s1112_s30 = sadd.s32 4294967295, %s1536_s29   ;;  %s1536_s29 = sphi %s1601_s29, %s31_s29   ;;  %s1532_s28 = sphi %s1599_s28, %s1884_s28   ;;  %s1528_s27 = sphi %s1597_s27, %s1883_s27   ;;  %s1524_s26 = sphi %s1595_s26, %s1879_s26   ;;  %s1520_s25 = sphi %s1593_s25, %s1882_s25   ;;  %s1516_s24 = sphi %s1591_s24, %s1881_s24  }
  0x10   : > { %1861 = sst [smem:[#allocation21_spill]] %s1524_s26  ;;  %p1114_p0 = scmp.ge.s32.totalorder %s1536_s29, 1 }
  0x11   : > { %1862 = sst [smem:[#allocation22_spill]] %s1536_s29  ;;  %p1625_p1 = scmp.eq.s32.totalorder %s1112_s30, 0 }
  0x12   : > { %p271_p2 = scmp.lt.s32.totalorder %s1536_s29, 3  ;;  %s1864_s1 = sld [smem:[#allocation26_spill]] }
  0x13   : > { %s1538_s13 = smov [#allocation7]   ;;  %p1119_p6 = scmp.ge.s32.totalorder %s1536_s29, 2 }
  0x14   : > { %p1633_p3 = pnand %p1114_p0, %p271_p2  ;;  %s287_s14 = sshll.u32 %s1538_s13, 4  ;;  %s288_s14 = int_to_ptr.vmem [resolvable:$true] %s287_s14 }
  0x15   : > { %s1866_s3 = sld [smem:[#allocation27_spill]]  ;;  %s1539_s18 = smov 64  }
  0x16   : > { %p1188_p4 = pneg %p1633_p3  ;;  %s1540_s19 = smov 4  }
  0x17   : > { %s1541_s20 = smov [#allocation9]   ;;  %s1113_s22 = sadd.s32 4294967294, %s1536_s29  }
  0x18   : > { %s285_s11 = sshll.u32 %s1864_s1, 4  ;;  %p1189_p5 = pnand %p1188_p4, %p1625_p1  ;;  %s286_s11 = int_to_ptr.hbm [resolvable:$true] %s285_s11 }
  0x19   : > { %s310_s21 = sshll.u32 %s1541_s20, 4  ;;  %s50_s23 = sadd.s32 1, %s1532_s28  ;;  %s311_s21 = int_to_ptr.vmem [resolvable:$true] %s310_s21 }
  0x1a   : > { %1191 = dma.hbm_to_vmem [thread:$0]  (!%p1189_p5), %s286_s11, 256, %s288_s14, [#allocation8], %s1539_s18, %s1539_s18, %s1540_s19  }
  0x1b   : > { %s308_s17 = sshll.u32 %s1866_s3, 4  ;;  %p52_p7 = scmp.ge.s32.totalorder %s50_s23, 2  ;;  %s309_s17 = int_to_ptr.hbm [resolvable:$true] %s308_s17 }
  0x1c   : > { %1194 = dma.hbm_to_vmem [thread:$0]  (!%p1189_p5), %s309_s17, 256, %s311_s21, [#allocation8], %s1539_s18, %s1539_s18, %s1540_s19  }
  0x1d   : > { %s57_s9 = sadd.s32 1, %s1524_s26  ;;  %p64_p8 = scmp.ne.s32.totalorder %s1524_s26, %s1520_s25 }
  0x1e   : > { %p65_p9 = scmp.eq.s32.totalorder %s1536_s29, 0  ;;  %s1886_s23 = smov (%p52_p7, %s50_s23), 0 }
  0x1f   : > { %1867 = sst [smem:[#allocation23_spill]] %s1886_s23  ;;  %p70_p11 = scmp.ne.s32.totalorder %s1520_s25, %s1516_s24 }
  0x20   : > { %p1653_p10 = por %p65_p9, %p64_p8  ;;  %s54_s11 = ssub.s32 %s1532_s28, %s1886_s23 }
  0x21   : > { %p228_p12 = scmp.eq.s32.totalorder %s1112_s30, 1  ;;  %p55_p13 = scmp.eq.s32.totalorder %s54_s11, 0 }
  0x22   : > { %p1665_p0 = por %p1625_p1, %p70_p11  ;;  %p234_p4 = scmp.eq.s32.totalorder %s1113_s22, 1 }
  0x23   : > { %p1669_p2 = por %p228_p12, %p64_p8  ;;  %p1211_p7 = scmp.lt.s32.totalorder %s1536_s29, 2 }
  0x24   : > { %s1674_s15 = scalar_select %p55_p13, %s1524_s26, %s57_s9  }
  0x25   : > { %p1676_p5 = por %p234_p4, %p70_p11  ;;  %s330_s30 = sand.u32 1, %s1524_s26  }
  0x26   : > { %1871 = sst [smem:[#allocation24_spill]] %s1674_s15  ;;  %s1121_s17 = sshll.u32 %s1532_s28, 2 }
  0x27   : > { %s1872_s16 = scalar_select %p1676_p5, 1, 0 }
  0x28   : > { %s1120_s18 = sshll.u32 %s330_s30, 2  ;;  %s338_s21 = scalar_lea.hbm %s1842_s0, %s1121_s17 }
  0x29   : > { %1873 = sst [smem:[#allocation25_spill]] %s1872_s16  ;;  %s340_s11 = sshll.u32 %s338_s21, 4  ;;  %s341_s11 = int_to_ptr.hbm [resolvable:$true] %s340_s11 }
  0x2a   : > { %s334_s1 = scalar_lea.vmem [#allocation4], %s1120_s18  ;;  %p1196_p8 = pnand %p1211_p7, %p1653_p10 }
  0x2b   : > { %s342_s3 = sshll.u32 %s334_s1, 4  ;;  %s1122_s22 = sshll.u32 %s330_s30, 3  ;;  %s343_s3 = int_to_ptr.vmem [resolvable:$true] %s342_s3 }
  0x2c   : > { %s1123_s9 = sshll.u32 %s1532_s28, 3  ;;  %s331_s23 = scalar_lea.sflag [#allocation5], %s330_s30 }
  0x2d   : > { %1198 = dma.hbm_to_vmem [thread:$0]  (!%p1196_p8), %s341_s11, 64, %s343_s3, %s331_s23  }
  0x2e   : > { %s357_s26 = scalar_lea.hbm %s1847_s5, %s1123_s9  ;;  %s353_s16 = scalar_lea.vmem [#allocation10], %s1122_s22 }
  0x2f   : > { %s361_s24 = sshll.u32 %s353_s16, 4  ;;  %s359_s6 = sshll.u32 %s357_s26, 4  ;;  %s362_s24 = int_to_ptr.vmem [resolvable:$true] %s361_s24  ;;  %s360_s6 = int_to_ptr.hbm [resolvable:$true] %s359_s6 }
  0x30   : > { %s350_s17 = scalar_lea.sflag [#allocation11], %s330_s30  ;;  %370 = sbr.rel (%p1633_p3) target bundleno = 1276 (0x4fc), region = 44 }
  0x31   : > { %1201 = dma.hbm_to_vmem [thread:$0]  (!%p1196_p8), %s360_s6, 128, %s362_s24, %s350_s17  }
  0x32   : > { %s1695_s1 = sand.u32 (!%p1633_p3), 1, %s1520_s25  }
  0x33   : > { %s1125_s3 = sshll.u32 (!%p1633_p3), %s1695_s1, 2  ;;  %s373_s23 = scalar_lea.sflag (!%p1633_p3), [#allocation5], %s1695_s1 }
  0x34   : > { %s376_s29 = scalar_lea.vmem (!%p1633_p3), [#allocation4], %s1125_s3 }
  0x35   : > { %1495 = dma.done.wait (%p1665_p0), %s373_s23, 64  }
  0x36   : > { %1497 = vsyncadd (%p1665_p0), %s373_s23, 4294967232 }
  0x37   : > { %1499 = dma.done.wait (%p1625_p1), [#allocation8], 512  }
  0x38   : > { %1501 = vsyncadd (%p1625_p1), [#allocation8], 4294966784  ;;  %s1128_s6 = sshll.u32 %s1695_s1, 3  ;;  %s393_s24 = scalar_lea.sflag [#allocation11], %s1695_s1 }
  0x39   : > { %s1711_s26 = scalar_lea.vmem [#allocation10], %s1128_s6 }
  0x3a   : > { %1503 = dma.done.wait (%p1665_p0), %s393_s24, 128  }
  0x3b   : > { %1505 = vsyncadd (%p1665_p0), %s393_s24, 4294967168  ;;  %v1168_v0 = vld [vmem:[#allocation9 + $0x8] sm:$0xff]  ;;  %v1170_v1 = vld [vmem:[#allocation7 + $0x8] sm:$0xff]  ;;  %vm477_vm0 = vcmask 261120   ;;  %vm495_vm1 = vcmask 257024   ;;  %s1542_s15 = smov 96  }
  0x3c   : > { %v1167_v2 = vld [vmem:[#allocation9] sm:$0xff]  ;;  %487 = vmatpush.bf16.msra.mxu0 %v1168_v0  ;;  %538 = vmatpush.bf16.msra.mxu1 %v1170_v1  ;;  %v1169_v3 = vld [vmem:[#allocation7] sm:$0xff]  ;;  %v456_v4 = vld [vmem:[%s376_s29] sm:$0xf]  ;;  %s1543_s16 = smov 120   ;;  %vm549_vm2 = vcmask 64512  }
  0x3d   : > { %v507_v5 = vld [vmem:[%s376_s29] sm:$0xf]  ;;  %v1276_v6 = vld [vmem:[%s1846_s4] ss:$0 sm:$0xff]  ;;  %s1544_s30 = smov 112   ;;  %s1545_s18 = smov 104  }
  0x3e   : > { %v1277_v7 = vld [vmem:[%s1844_s2] ss:$0 sm:$0xff]  ;;  %vm600_vm3 = vcmask 1043456   ;;  %v1741_v35 = vld [vmem:[%s1711_s26] sm:$0xff]  ;;  %s1130_s19 = sshll.u32 %s1695_s1, 4  ;;  %vm594_vm8 = vcmask 60416  }
  0x3f   : > { %s1751_s20 = scalar_lea.vmem [#allocation13], %s1130_s19  ;;  %s1546_s21 = smov 16  }
  0x40   : > { %488 = vmatpush.bf16.msra.mxu0 %v1167_v2  ;;  %539 = vmatpush.bf16.msra.mxu1 %v1169_v3  ;;  %s912_s11 = sshll.u32 %s1751_s20, 4  ;;  %s1171_s22 = sshll.u32 %s1528_s27, 4  ;;  %s913_s11 = int_to_ptr.vmem [resolvable:$true] %s912_s11 }
  0x41   : > { %s911_s3 = scalar_lea.hbm %s1849_s7, %s1171_s22  ;;  %s881_s29 = scalar_lea.sflag [#allocation14], %s1695_s1 }
  0x42   : > { %s914_s23 = sshll.u32 %s911_s3, 4  ;;  %s1434_s10 = scalar_lea.hbm %s1849_s7, 32  ;;  %s915_s23 = int_to_ptr.hbm [resolvable:$true] %s914_s23 }
  0x43   : > { %1139 = vmatmul.msk.bf16.vlgmr.msra.gmra.mxu0 %vm477_vm0, %v456_v4  ;;  %1148 = vmatmul.msk.bf16.vlgmr.msra.gmra.mxu1 %vm477_vm0, %v507_v5  ;;  %s1428_s24 = sshra.s32 %s915_s23, 4  ;;  %s1429_s24 = int_to_ptr.hbm [resolvable:$true] %s1428_s24 }
  0x44   : > { %s1430_s26 = scalar_lea.hbm %s1429_s24, 16  ;;  %p1435_p10 = scmp.lt.s32.totalorder %s1429_s24, %s1849_s7 }
  0x45   : > { %p1431_p1 = scmp.ne.s32.totalorder %s1429_s24, %s1430_s26  ;;  %p1436_p11 = scmp.lt.s32.totalorder %s1434_s10, %s1430_s26 }
  0x47   : > { %p1432_p3 = pnand %p1431_p1, %p1669_p2  ;;  %p1437_p12 = por %p1436_p11, %p1435_p10 }
  0x49   : > { %p1433_p9 = pneg %p1432_p3 }
  0x4b   : > { %p1438_p13 = pnand %p1437_p12, %p1433_p9 }
  0xc0   : > { %v490_v8 = vpop.f32.mrf.mxu0  ;;  %v541_v9 = vpop.f32.mrf.mxu1 }
  0xc1   : > { %v491_v10 = vadd.f32 %v1276_v6, %v490_v8  ;;  %v542_v11 = vadd.f32 %v1277_v7, %v541_v9 }
  0xc3   : > { %v494_v12 = vpack.c.bf16 %v491_v10, %v491_v10  ;;  %v545_v13 = vpack.c.bf16 %v542_v11, %v542_v11 }
  0xc5   : > { %496 = vst.msk [vmem:[#allocation2] sm:$0xf] %vm495_vm1, %v494_v12  ;;  %v619_v14 = vunpack.c.l.b16 %v545_v13  ;;  %498 = vrot.lane.b32.xlu1 %v494_v12, %s1542_s15 }
  0xc7   : > { %v620_v15 = vpack.c.b16 %v619_v14, %v619_v14 }
  0xc8   : > { %v492_v16 = vpop.f32.mrf.mxu0  ;;  %v543_v17 = vpop.f32.mrf.mxu1 }
  0xc9   : > { %621 = vrot.lane.b32.xlu2 %v620_v15, %s1543_s16 }
  0xcc   : > { %v548_v18 = vld [vmem:[#allocation2] sm:$0xf] }
  0xcd   : > { %v699_v19 = vld [vmem:[#allocation2] sm:$0xf]  ;;  %v554_v21 = vsel %vm549_vm2, %v548_v18, 0 }
  0xce   : > { %v617_v20 = vld [vmem:[#allocation2] sm:$0xf]  ;;  %v703_v22 = vunpack.c.l.b16 %v699_v19  ;;  %563 = vmatpush.bf16.xpose.msra.mxu2 %v554_v21 }
  0xcf   : > { %v624_v23 = vunpack.c.l.b16 %v617_v20  ;;  %v778_v49 = vld [vmem:[#allocation2] sm:$0xf] }
  0xd0   : > { %v704_v24 = vpack.c.b16 %v703_v22, %v703_v22  ;;  %v782_v50 = vunpack.c.l.b16 %v778_v49 }
  0xd1   : > { %v625_v25 = vpack.c.b16 %v624_v23, %v624_v23 }
  0xd2   : > { %705 = vrot.lane.b32.xlu2 %v704_v24, %s1544_s30  ;;  %v783_v51 = vpack.c.b16 %v782_v50, %v782_v50 }
  0xd3   : > { %626 = vrot.lane.b32.xlu1 %v625_v25, %s1543_s16 }
  0xd5   : > { %1149 = vmatmul.msk.bf16.vlgmr.msra.gmra.mxu2 %vm549_vm2, %v545_v13 }
  0xda   : > { %779 = vrot.lane.b32.xlu2 %v620_v15, %s1545_s18 }
  0xdb   : > { %700 = vrot.lane.b32.xlu1 %v620_v15, %s1544_s30 }
 0x123   : > { %v1733_v26 = vpop.permute.xlu2 %621 }
 0x12c   : > { %v706_v27 = vpop.permute.xlu2 %705 }
 0x12d   : > { %v711_v28 = vsel %vm549_vm2, %v706_v27, 0 }
 0x12e   : > { %720 = vmatpush.bf16.xpose.msrb.mxu1 %v711_v28 }
 0x134   : > { %v780_v3 = vpop.permute.xlu2 %779 }
 0x137   : > { %v499_v29 = vpop.permute.xlu1 %498 }
 0x138   : > { %501 = vst.msk [vmem:[#allocation3] sm:$0xf] %vm495_vm1, %v499_v29 }
 0x13f   : > { %v596_v30 = vld [vmem:[#allocation3] sm:$0xf] }
 0x140   : > { %v602_v31 = vsel %vm600_vm3, %v596_v30, 0  ;;  %v674_v19 = vld [vmem:[#allocation3] sm:$0xf] }
 0x141   : > { %611 = vmatpush.bf16.msra.mxu3 %v602_v31  ;;  %v676_v20 = vunpack.c.l.b16 %v674_v19  ;;  %v753_v21 = vld [vmem:[#allocation3] sm:$0xf] }
 0x142   : > { %v755_v22 = vunpack.c.l.b16 %v753_v21 }
 0x143   : > { %v677_v23 = vpack.c.b16 %v676_v20, %v676_v20 }
 0x144   : > { %v756_v24 = vpack.c.b16 %v755_v22, %v755_v22 }
 0x145   : > { %v627_v32 = vpop.permute.xlu1 %626 }
 0x146   : > { %v632_v33 = vsel %vm549_vm2, %v627_v32, 0 }
 0x147   : > { %641 = vmatpush.bf16.xpose.msrb.mxu3 %v632_v33 }
 0x14d   : > { %v701_v34 = vpop.permute.xlu1 %700 }
 0x14e   : > { %1154 = vmatmul.msk.bf16.vlgmr.msrb.gmra.mxu1 %vm549_vm2, %v701_v34 }
 0x158   : > { %v565_v36 = vpop.f32.mrf.mxu2 }
 0x159   : > { %v566_v37 = vadd.f32 %v565_v36, %v1741_v35 }
 0x15b   : > { %v569_v38 = vsel %vm549_vm2, %v566_v37, -inf }
 0x15c   : > { %570 = vmax.xlane.f32.xlu0 %v569_v38 }
 0x160   : > { %v567_v39 = vpop.f32.mrf.mxu2 }
 0x1cb   : > { %v722_v40 = vpop.f32.mrf.mxu1 }
 0x1cc   : > { %v723_v41 = vadd.f32 %v722_v40, %v1741_v35 }
 0x1ce   : > { %v726_v42 = vsel %vm549_vm2, %v723_v41, -inf }
 0x1cf   : > { %727 = vmax.xlane.f32.xlu2 %v726_v42  ;;  %v571_v43 = vpop.xlane.xlu0 %570 }
 0x1d0   : > { %v572_v44 = vsub.f32 %v566_v37, %v571_v43 }
 0x1d2   : > { %v573_v46 = vmul.f32 1.442695, %v572_v44 }
 0x1d3   : > { %v724_v45 = vpop.f32.mrf.mxu1 }
 0x1d4   : > { %1278 = vpow2.f32 %v573_v46 }
 0x1da   : > { %v1279_v47 = vpop.eup %1278 }
 0x1db   : > { %v575_v48 = vsel %vm549_vm2, %v1279_v47, 0.0 }
 0x1dc   : > { %576 = vadd.xlane.f32.xlu0 %v575_v48 }
 0x1f0   : > { %784 = vrot.lane.b32.xlu0 %v783_v51, %s1545_s18 }
 0x242   : > { %v728_v5 = vpop.xlane.xlu2 %727 }
 0x243   : > { %v729_v7 = vsub.f32 %v723_v41, %v728_v5 }
 0x245   : > { %v730_v8 = vmul.f32 1.442695, %v729_v7 }
 0x24f   : > { %v577_v52 = vpop.xlane.xlu0 %576 }
 0x250   : > { %1280 = vrcp.f32 %v577_v52  ;;  %v589_v56 = vand.u32 2147483648, %v577_v52  ;;  %v587_v58 = vand.u32 2147483647, %v577_v52  ;;  %vm583_vm5 = vweird.f32 %v577_v52 }
 0x251   : > { %1282 = vpow2.f32 %v730_v8 }
 0x252   : > { %v590_v60 = vor.u32 1.1754944e-38, %v589_v56  ;;  %vm588_vm7 = vcmp.eq.f32.partialorder %v587_v58, 8.507059e+37 }
 0x256   : > { %v1281_v53 = vpop.eup %1280 }
 0x257   : > { %v579_v54 = vmul.f32 %v1281_v53, %v577_v52  ;;  %vm584_vm4 = vweird.f32 %v1281_v53  ;;  %v1283_v12 = vpop.eup %1282  ;;  %v832_v52 = vld [vmem:[#allocation3] sm:$0xf] }
 0x258   : > { %vm585_vm6 = vmor %vm583_vm5, %vm584_vm4  ;;  %v732_v14 = vsel %vm549_vm2, %v1283_v12, 0.0 }
 0x259   : > { %v580_v55 = vsub.f32 1.0, %v579_v54 }
 0x25b   : > { %v581_v57 = vmul.f32 %v1281_v53, %v580_v55 }
 0x25d   : > { %v582_v59 = vadd.f32 %v1281_v53, %v581_v57 }
 0x25f   : > { %v586_v61 = vsel %vm585_vm6, %v1281_v53, %v582_v59  ;;  %v834_v53 = vunpack.c.l.b16 %v832_v52 }
 0x260   : > { %v591_v62 = vsel %vm588_vm7, %v590_v60, %v586_v61 }
 0x261   : > { %v592_v63 = vmul.f32 %v1279_v47, %v591_v62  ;;  %v835_v54 = vpack.c.b16 %v834_v53, %v834_v53 }
 0x262   : > { %v785_v0 = vpop.permute.xlu0 %784 }
 0x263   : > { %v790_v1 = vsel %vm549_vm2, %v785_v0, 0  ;;  %v593_v2 = vpack.c.bf16 %v592_v63, %v592_v63 }
 0x265   : > { %595 = vst.msk [vmem:[%s1751_s20] sm:$0xf] %vm594_vm8, %v593_v2  ;;  %1150 = vmatmul.msk.bf16.vlgmr.msra.gmra.mxu3 %vm549_vm2, %v593_v2 }
 0x266   : > { %799 = vmatpush.bf16.xpose.msra.mxu3 %v790_v1 }
 0x275   : > { %1151 = vmatmul.msk.bf16.vlgmr.msrb.gmra.mxu3 %vm549_vm2, %v1733_v26 }
 0x285   : > { %1157 = vmatmul.msk.bf16.vlgmr.msra.gmra.mxu3 %vm549_vm2, %v780_v3 }
 0x2e8   : > { %v1759_v4 = vpop.f32.mrf.mxu3 }
 0x2f0   : > { %v615_v6 = vpop.f32.mrf.mxu3 }
 0x2f8   : > { %v643_v9 = vpop.f32.mrf.mxu3 }
 0x2f9   : > { %v644_v10 = vadd.f32 %v643_v9, %v1741_v35 }
 0x2fb   : > { %v647_v11 = vsel %vm549_vm2, %v644_v10, -inf }
 0x2fc   : > { %648 = vmax.xlane.f32.xlu1 %v647_v11 }
 0x300   : > { %v645_v13 = vpop.f32.mrf.mxu3 }
 0x304   : > { %733 = vadd.xlane.f32.xlu1 %v732_v14 }
 0x308   : > { %v801_v15 = vpop.f32.mrf.mxu3 }
 0x309   : > { %v802_v16 = vadd.f32 %v801_v15, %v1741_v35 }
 0x30b   : > { %v805_v17 = vsel %vm549_vm2, %v802_v16, -inf }
 0x30c   : > { %806 = vmax.xlane.f32.xlu0 %v805_v17 }
 0x310   : > { %v803_v18 = vpop.f32.mrf.mxu3 }
 0x31d   : > { %678 = vrot.lane.b32.xlu1 %v677_v23, %s1543_s16 }
 0x320   : > { %757 = vrot.lane.b32.xlu0 %v756_v24, %s1544_s30 }
 0x36f   : > { %v649_v25 = vpop.xlane.xlu1 %648 }
 0x370   : > { %v650_v26 = vsub.f32 %v644_v10, %v649_v25 }
 0x372   : > { %v651_v27 = vmul.f32 1.442695, %v650_v26 }
 0x374   : > { %1284 = vpow2.f32 %v651_v27 }
 0x377   : > { %v734_v28 = vpop.xlane.xlu1 %733 }
 0x378   : > { %1286 = vrcp.f32 %v734_v28  ;;  %v746_v36 = vand.u32 2147483648, %v734_v28  ;;  %v744_v39 = vand.u32 2147483647, %v734_v28  ;;  %vm740_vm10 = vweird.f32 %v734_v28 }
 0x37a   : > { %v1285_v29 = vpop.eup %1284  ;;  %v747_v41 = vor.u32 1.1754944e-38, %v746_v36  ;;  %vm745_vm12 = vcmp.eq.f32.partialorder %v744_v39, 8.507059e+37 }
 0x37b   : > { %v653_v30 = vsel %vm549_vm2, %v1285_v29, 0.0 }
 0x37c   : > { %654 = vadd.xlane.f32.xlu2 %v653_v30 }
 0x37e   : > { %v1287_v31 = vpop.eup %1286 }
 0x37f   : > { %v736_v32 = vmul.f32 %v1287_v31, %v734_v28  ;;  %v807_v33 = vpop.xlane.xlu0 %806  ;;  %vm741_vm9 = vweird.f32 %v1287_v31 }
 0x380   : > { %v808_v34 = vsub.f32 %v802_v16, %v807_v33  ;;  %vm742_vm11 = vmor %vm740_vm10, %vm741_vm9 }
 0x381   : > { %v737_v35 = vsub.f32 1.0, %v736_v32 }
 0x382   : > { %v809_v37 = vmul.f32 1.442695, %v808_v34 }
 0x383   : > { %v738_v38 = vmul.f32 %v1287_v31, %v737_v35 }
 0x384   : > { %1288 = vpow2.f32 %v809_v37 }
 0x385   : > { %v739_v40 = vadd.f32 %v1287_v31, %v738_v38 }
 0x387   : > { %v743_v42 = vsel %vm742_vm11, %v1287_v31, %v739_v40 }
 0x388   : > { %v748_v43 = vsel %vm745_vm12, %v747_v41, %v743_v42 }
 0x389   : > { %v749_v44 = vmul.f32 %v1283_v12, %v748_v43 }
 0x38a   : > { %v1289_v45 = vpop.eup %1288 }
 0x38b   : > { %v811_v46 = vsel %vm549_vm2, %v1289_v45, 0.0  ;;  %v750_v47 = vpack.c.bf16 %v749_v44, %v749_v44 }
 0x38c   : > { %812 = vadd.xlane.f32.xlu2 %v811_v46 }
 0x38d   : > { %1155 = vst.msk [vmem:[%s1751_s20 + $0x8] sm:$0xf] %vm594_vm8, %v750_v47 }
 0x38f   : > { %v679_v48 = vpop.permute.xlu1 %678 }
 0x390   : > { %v684_v49 = vsel %vm600_vm3, %v679_v48, 0 }
 0x391   : > { %693 = vmatpush.bf16.msrb.mxu0 %v684_v49 }
 0x392   : > { %v758_v50 = vpop.permute.xlu0 %757 }
 0x393   : > { %v763_v51 = vsel %vm600_vm3, %v758_v50, 0 }
 0x394   : > { %772 = vmatpush.bf16.msrb.mxu2 %v763_v51 }
 0x397   : > { %1156 = vmatmul.msk.bf16.vlgmr.msrb.gmra.mxu2 %vm549_vm2, %v750_v47 }
 0x3a4   : > { %836 = vrot.lane.b32.xlu2 %v835_v54, %s1545_s18 }
 0x3ef   : > { %v655_v55 = vpop.xlane.xlu2 %654 }
 0x3f0   : > { %1290 = vrcp.f32 %v655_v55  ;;  %v667_v60 = vand.u32 2147483648, %v655_v55  ;;  %v665_v61 = vand.u32 2147483647, %v655_v55  ;;  %vm661_vm14 = vweird.f32 %v655_v55 }
 0x3f2   : > { %v668_v63 = vor.u32 1.1754944e-38, %v667_v60  ;;  %vm666_vm1 = vcmp.eq.f32.partialorder %v665_v61, 8.507059e+37 }
 0x3f6   : > { %v1291_v56 = vpop.eup %1290 }
 0x3f7   : > { %v657_v57 = vmul.f32 %v1291_v56, %v655_v55  ;;  %vm662_vm13 = vweird.f32 %v1291_v56 }
 0x3f8   : > { %vm663_vm15 = vmor %vm661_vm14, %vm662_vm13 }
 0x3f9   : > { %v658_v58 = vsub.f32 1.0, %v657_v57 }
 0x3fb   : > { %v659_v59 = vmul.f32 %v1291_v56, %v658_v58 }
 0x3fd   : > { %v660_v62 = vadd.f32 %v1291_v56, %v659_v59 }
 0x3ff   : > { %v813_v0 = vpop.xlane.xlu2 %812  ;;  %v664_v1 = vsel %vm663_vm15, %v1291_v56, %v660_v62 }
 0x400   : > { %1292 = vrcp.f32 %v813_v0  ;;  %v669_v2 = vsel %vm666_vm1, %v668_v63, %v664_v1  ;;  %v825_v11 = vand.u32 2147483648, %v813_v0  ;;  %v823_v13 = vand.u32 2147483647, %v813_v0 }
 0x401   : > { %v670_v3 = vmul.f32 %v1285_v29, %v669_v2  ;;  %vm819_vm5 = vweird.f32 %v813_v0 }
 0x402   : > { %v826_v15 = vor.u32 1.1754944e-38, %v825_v11  ;;  %vm824_vm7 = vcmp.eq.f32.partialorder %v823_v13, 8.507059e+37 }
 0x403   : > { %v671_v5 = vpack.c.bf16 %v670_v3, %v670_v3 }
 0x405   : > { %1152 = vst.msk [vmem:[%s1751_s20 + $0x4] sm:$0xf] %vm594_vm8, %v671_v5  ;;  %1153 = vmatmul.msk.bf16.vlgmr.msrb.gmra.mxu0 %vm549_vm2, %v671_v5 }
 0x406   : > { %v1293_v6 = vpop.eup %1292 }
 0x407   : > { %v815_v7 = vmul.f32 %v1293_v6, %v813_v0  ;;  %v837_v8 = vpop.permute.xlu2 %836  ;;  %vm820_vm4 = vweird.f32 %v1293_v6 }
 0x408   : > { %v842_v9 = vsel %vm600_vm3, %v837_v8, 0  ;;  %vm821_vm6 = vmor %vm819_vm5, %vm820_vm4 }
 0x409   : > { %v816_v10 = vsub.f32 1.0, %v815_v7  ;;  %851 = vmatpush.bf16.msra.mxu0 %v842_v9 }
 0x40b   : > { %v817_v12 = vmul.f32 %v1293_v6, %v816_v10 }
 0x40d   : > { %v818_v14 = vadd.f32 %v1293_v6, %v817_v12 }
 0x40f   : > { %v822_v16 = vsel %vm821_vm6, %v1293_v6, %v818_v14 }
 0x410   : > { %v827_v17 = vsel %vm824_vm7, %v826_v15, %v822_v16 }
 0x411   : > { %v828_v18 = vmul.f32 %v1289_v45, %v827_v17 }
 0x413   : > { %v829_v19 = vpack.c.bf16 %v828_v18, %v828_v18 }
 0x415   : > { %1158 = vst.msk [vmem:[%s1751_s20 + $0xc] sm:$0xf] %vm594_vm8, %v829_v19  ;;  %1159 = vmatmul.msk.bf16.vlgmr.msra.gmra.mxu0 %vm549_vm2, %v829_v19 }
 0x41a   : > { %v774_v20 = vpop.f32.mrf.mxu2 }
 0x41b   : > { %862 = vrot.lane.b32.xlu1 %v774_v20, %s1546_s21 }
 0x422   : > { %v776_v21 = vpop.f32.mrf.mxu2 }
 0x423   : > { %1441 = shalt.err (!%p1438_p13)
}
 0x424   : > { %s1547_s16 = smov 64   ;;  %s1548_s30 = smov 4   ;;  %vm870_vm3 = vcmask 130048   ;;  %vm872_vm8 = vcmask 195584  }
 0x425   : > { %1185 = dma.vmem_to_hbm [thread:$0]  (%p1669_p2), %s913_s11, 256, %s915_s23, %s881_s29, %s1547_s16, %s1547_s16, %s1548_s30  }
 0x426   : > { %s1549_s18 = smov 8   ;;  %s1550_s19 = smov 24  }
 0x427   : > { %s1162_s20 = sshll.u32 %s1528_s27, 3  ;;  %s1874_s9 = sld [smem:[#allocation28_spill]] }
 0x428   : > { %s436_s3 = scalar_lea.vmem [#allocation12], %s1128_s6  ;;  %s876_s27 = scalar_lea.sflag [#allocation6], %s1695_s1 }
 0x429   : > { %s895_s24 = sshll.u32 %s436_s3, 4  ;;  %s896_s24 = int_to_ptr.vmem [resolvable:$true] %s895_s24 }
 0x42d   : > { %s893_s17 = scalar_lea.hbm %s1874_s9, %s1162_s20  ;;  %s1462_s8 = scalar_lea.hbm %s1874_s9, 16 }
 0x42e   : > { %s897_s26 = sshll.u32 %s893_s17, 4  ;;  %s898_s26 = int_to_ptr.hbm [resolvable:$true] %s897_s26 }
 0x42f   : > { %s1456_s11 = sshra.s32 %s898_s26, 4  ;;  %s1457_s11 = int_to_ptr.hbm [resolvable:$true] %s1456_s11 }
 0x430   : > { %s1458_s6 = scalar_lea.hbm %s1457_s11, 8  ;;  %p1463_p8 = scmp.lt.s32.totalorder %s1457_s11, %s1874_s9 }
 0x431   : > { %p1459_p0 = scmp.ne.s32.totalorder %s1457_s11, %s1458_s6  ;;  %p1464_p1 = scmp.lt.s32.totalorder %s1462_s8, %s1458_s6 }
 0x433   : > { %p1460_p4 = pnand %p1459_p0, %p1669_p2  ;;  %p1465_p3 = por %p1464_p1, %p1463_p8 }
 0x435   : > { %p1461_p7 = pneg %p1460_p4 }
 0x437   : > { %p1466_p9 = pnand %p1465_p3, %p1461_p7 }
 0x482   : > { %v695_v22 = vpop.f32.mrf.mxu0 }
 0x483   : > { %858 = vrot.lane.b32.xlu0 %v695_v22, %s1549_s18 }
 0x48a   : > { %v697_v23 = vpop.f32.mrf.mxu0 }
 0x48d   : > { %v863_v27 = vpop.permute.xlu1 %862 }
 0x492   : > { %v853_v24 = vpop.f32.mrf.mxu0 }
 0x493   : > { %866 = vrot.lane.b32.xlu2 %v853_v24, %s1550_s19 }
 0x49a   : > { %v855_v25 = vpop.f32.mrf.mxu0 }
 0x4ed   : > { %v867_v29 = vpop.permute.xlu2 %866 }
 0x4f5   : > { %v859_v26 = vpop.permute.xlu0 %858 }
 0x4f6   : > { %v869_v28 = vsel %vm549_vm2, %v1759_v4, %v859_v26 }
 0x4f7   : > { %v871_v30 = vsel %vm870_vm3, %v869_v28, %v863_v27 }
 0x4f8   : > { %v873_v31 = vsel %vm872_vm8, %v871_v30, %v867_v29 }
 0x4f9   : > { %874 = vst.msk [vmem:[%s436_s3] sm:$0xff] %vm477_vm0, %v873_v31 }
 0x4fa   : > { %1469 = shalt.err (!%p1466_p9)
}
 0x4fb   : > { %1184 = dma.vmem_to_hbm [thread:$0]  (%p1669_p2), %s896_s24, 128, %s898_s26, %s876_s27  }
 0x4fc PF: > { %s1875_s1 = sld [smem:[#allocation20_spill]]  ;;  %p1203_p10 = pnand %p1119_p6, %p1676_p5 }
 0x4fd   : > { %s1877_s15 = sld [smem:[#allocation22_spill]] }
 0x4fe   : > { %p1204_p11 = pneg %p1203_p10 }
 0x502   : > { %s929_s16 = sand.u32 1, %s1875_s1  }
 0x503   : > { %s930_s30 = scalar_lea.sflag [#allocation6], %s929_s16 }
 0x504   : > { %1507 = dma.done.wait (%p1204_p11), %s930_s30, 128  }
 0x505   : > { %1509 = vsyncadd (%p1204_p11), %s930_s30, 4294967168  ;;  %s940_s18 = scalar_lea.sflag [#allocation14], %s929_s16 }
 0x506   : > { %1511 = dma.done.wait (%p1204_p11), %s940_s18, 256  }
 0x507   : > { %1513 = vsyncadd (%p1204_p11), %s940_s18, 4294967040  ;;  %s31_s29 = sadd.s32 1, %s1877_s15   ;;  %s1878_s14 = sld [smem:[#allocation21_spill]] }
 0x508   : > { %p28_p12 = scmp.ge.s32.totalorder %s31_s29, 4   ;;  %s1879_s26 = sld [smem:[#allocation24_spill]] }
 0x509   : > { %s1880_s19 = sld [smem:[#allocation23_spill]]  ;;  %s1881_s24 = smov %s1520_s25 }
 0x50a   : > { %s1883_s27 = smov %s1532_s28 }
 0x50b   :  { %30 = sbr.rel (!%p28_p12) target bundleno = 15 (0xf), region = 144 }
 0x50d   : > { %s1882_s25 = smov %s1878_s14 }
 0x50f   : > { %s1884_s28 = smov %s1880_s19 }
 0x510   :  { %946 = vsyncpa [#allocation5], 1 }
 0x511   :  { %948 = vsyncpa [#allocation5 + $0x1], 1 }
 0x512   :  { %949 = vsyncpa [#allocation8], 1 }
 0x513   :  { %950 = vsyncpa [#allocation11], 1 }
 0x514   :  { %952 = vsyncpa [#allocation11 + $0x1], 1 }
 0x515   :  { %953 = vsyncpa [#allocation6], 1 }
 0x516   :  { %955 = vsyncpa [#allocation6 + $0x1], 1 }
 0x517   :  { %956 = vsyncpa [#allocation14], 1 }
 0x518   :  { %958 = vsyncpa [#allocation14 + $0x1], 1 }

</bundles_post_ra>
